<compile_context>
chip_gen: v7x
topology: tpu7x:2x2x1
jax: 0.10.0
libtpu: 0.0.40
codegen_flags: <defaults>
</compile_context>

<pallas_src>
import jax
import jax.numpy as jnp
from jax.experimental import pallas as pl
from jax.experimental.pallas import tpu as pltpu


def encoder_kernel(idx_ref, t_mu_ref, t_sig_ref, m_mu_ref, m_sig_ref,
                   b_mu_ref, b_sig_ref, mu_ref, sig_ref):
    # idx_ref  : (nb, L)  int32 token ids, nb whole sentences per block
    # t_*_ref  : (Vp, D)  embedding @ W_x-part        (compute dtype)
    # m_*_ref  : (Vp, D)  embedding @ W_mean-part / L (compute dtype)
    # b_*_ref  : (1, D)   biases, f32
    # mu_ref / sig_ref : (nb, L, D) outputs
    nb, L = idx_ref.shape
    Vp, D = t_mu_ref.shape
    cdt = t_mu_ref.dtype

    idx = idx_ref[...]                                           # (nb, L) i32
    vocab = jax.lax.broadcasted_iota(jnp.int32, (nb, L, Vp), 2)
    onehot = (vocab == idx[:, :, None]).astype(cdt)              # (nb, L, Vp)
    oh_flat = onehot.reshape(nb * L, Vp)                         # (rows, Vp)

    # Per-sentence token counts (values <= L, exact even in bf16); counts @ M
    # reproduces  mean @ W_mean-part  with the 1/L folded into M.
    counts = jnp.sum(onehot, axis=1)                             # (nb, Vp)

    # ---- mu path (finish + store before starting sigma: lower live range) --
    main_mu = jnp.dot(oh_flat, t_mu_ref[...],
                      preferred_element_type=jnp.float32).reshape(nb, L, D)
    row_mu = jnp.dot(counts, m_mu_ref[...],
                     preferred_element_type=jnp.float32) + b_mu_ref[...]
    mu_ref[...] = (main_mu + row_mu[:, None, :]).astype(mu_ref.dtype)

    # ---- sigma path: softplus only on sigma elements (EUP is a single unit) -
    main_sig = jnp.dot(oh_flat, t_sig_ref[...],
                       preferred_element_type=jnp.float32).reshape(nb, L, D)
    row_sig = jnp.dot(counts, m_sig_ref[...],
                      preferred_element_type=jnp.float32) + b_sig_ref[...]
    sig_ref[...] = jax.nn.softplus(main_sig + row_sig[:, None, :]).astype(sig_ref.dtype)


def _default_vmem_limit_bytes():
    # v5e/v6e: 128 MiB physical -> ~96 MiB scoped; v7x: 64 MiB -> ~48 MiB.
    try:
        cap = pltpu.get_tpu_info().vmem_capacity_bytes
    except Exception:
        cap = 64 * 1024 * 1024
    return min(int(cap * 3 // 4), 100 * 1024 * 1024)


def encoder_forward(english, embedding, w_mu1, b_mu1, w_sig1, b_sig1,
                    *, compute_dtype=jnp.bfloat16, out_dtype=jnp.float32,
                    rows_per_block=None, vmem_limit_bytes=None):
    """english: (B, L) int indices.  embedding: (V, D) f32.
    w_mu1/w_sig1: (D, 2D) PyTorch-layout Linear weights.  b_*: (D,).
    Returns (mu, sigma), both (B, L, D) in out_dtype."""
    B, L = english.shape
    V, D = embedding.shape

    if vmem_limit_bytes is None:
        vmem_limit_bytes = _default_vmem_limit_bytes()
    if rows_per_block is None:
        # ~2-8 MB of output per grid step; bigger blocks on 128 MiB-VMEM gens.
        rows_per_block = 32768 if vmem_limit_bytes >= 64 * 1024 * 1024 else 16384

    # --- weight prep: split along the concat (K) axis and pre-multiply by E --
    # h @ W.T with h = [x, mean]  ==  x @ W.T[:D] + mean @ W.T[D:]
    # and x-rows are embedding rows, so fold the table in:  T = E @ W.T[:D],
    # M = E @ W.T[D:] / L  (mean -> per-sentence token-count matmul).
    hp = jax.lax.Precision.HIGHEST
    wt_mu, wt_sig = w_mu1.T, w_sig1.T                             # (2D, D)
    t_mu = jnp.dot(embedding, wt_mu[:D], precision=hp)            # (V, D)
    m_mu = jnp.dot(embedding, wt_mu[D:], precision=hp) / jnp.float32(L)
    t_sig = jnp.dot(embedding, wt_sig[:D], precision=hp)
    m_sig = jnp.dot(embedding, wt_sig[D:], precision=hp) / jnp.float32(L)

    # Pad vocab to a lane-dense multiple of 128 (zero rows are never selected).
    Vp = max(128, ((V + 127) // 128) * 128)
    pad_v = Vp - V

    def prep(t):
        return jnp.pad(t, ((0, pad_v), (0, 0))).astype(compute_dtype)

    t_mu, m_mu, t_sig, m_sig = map(prep, (t_mu, m_mu, t_sig, m_sig))
    b_mu = b_mu1.reshape(1, D).astype(jnp.float32)
    b_sig = b_sig1.reshape(1, D).astype(jnp.float32)

    # --- sentence blocking: whole sentences per step, nb multiple of 8 -------
    nb = max(1, rows_per_block // max(L, 1))
    nb = min(nb, B)
    nb = ((nb + 7) // 8) * 8          # int32 (nb, L) tile: sublane multiple of 8
    pad_b = (-B) % nb
    idx = english.astype(jnp.int32)
    if pad_b:
        idx = jnp.pad(idx, ((0, pad_b), (0, 0)))   # pad the tiny index array only
    Bp = B + pad_b
    grid = (Bp // nb,)

    mu, sigma = pl.pallas_call(
        encoder_kernel,
        out_shape=(jax.ShapeDtypeStruct((Bp, L, D), out_dtype),
                   jax.ShapeDtypeStruct((Bp, L, D), out_dtype)),
        grid_spec=pltpu.PrefetchScalarGridSpec(
            num_scalar_prefetch=0,
            grid=grid,
            in_specs=[
                pl.BlockSpec((nb, L), lambda i: (i, 0)),       # token ids
                pl.BlockSpec((Vp, D), lambda i: (0, 0)),       # T_mu   (resident)
                pl.BlockSpec((Vp, D), lambda i: (0, 0)),       # T_sig  (resident)
                pl.BlockSpec((Vp, D), lambda i: (0, 0)),       # M_mu   (resident)
                pl.BlockSpec((Vp, D), lambda i: (0, 0)),       # M_sig  (resident)
                pl.BlockSpec((1, D), lambda i: (0, 0)),        # b_mu
                pl.BlockSpec((1, D), lambda i: (0, 0)),        # b_sig
            ],
            out_specs=(pl.BlockSpec((nb, L, D), lambda i: (i, 0, 0)),
                       pl.BlockSpec((nb, L, D), lambda i: (i, 0, 0))),
        ),
        compiler_params=pltpu.CompilerParams(
            dimension_semantics=("parallel",),
            vmem_limit_bytes=vmem_limit_bytes,
        ),
    )(idx, t_mu, t_sig, m_mu, m_sig, b_mu, b_sig)

    if pad_b:
        mu, sigma = mu[:B], sigma[:B]
    return mu, sigma


def encoder_reference(english, embedding, w_mu1, b_mu1, w_sig1, b_sig1):
    """Pure-JAX f32 reference mirroring the PyTorch forward."""
    x = jnp.take(embedding, english, axis=0)                  # (B, L, D)
    mean = jnp.mean(x, axis=1, keepdims=True)                 # (B, 1, D)
    mean = jnp.broadcast_to(mean, x.shape)
    h = jnp.concatenate([x, mean], axis=2)                    # (B, L, 2D)
    mu = h @ w_mu1.T + b_mu1
    sigma = jax.nn.softplus(h @ w_sig1.T + b_sig1)
    return mu, sigma


if __name__ == "__main__":
    # Small, deterministic setup consistent with the module.
    vocab_size_e = 50
    dim = 32          # D
    batch = 2         # B
    seq = 8           # L

    key = jax.random.PRNGKey(0)
    k_emb, k_wmu, k_bmu, k_wsig, k_bsig, k_idx = jax.random.split(key, 6)

    embedding = jax.random.normal(k_emb, (vocab_size_e, dim), jnp.float32)
    w_mu1 = jax.random.normal(k_wmu, (dim, 2 * dim), jnp.float32) * 0.1
    b_mu1 = jax.random.normal(k_bmu, (dim,), jnp.float32) * 0.1
    w_sig1 = jax.random.normal(k_wsig, (dim, 2 * dim), jnp.float32) * 0.1
    b_sig1 = jax.random.normal(k_bsig, (dim,), jnp.float32) * 0.1
    english = jax.random.randint(k_idx, (batch, seq), 0, vocab_size_e,
                                 dtype=jnp.int32)

    mu_ref, sigma_ref = encoder_reference(english, embedding, w_mu1, b_mu1,
                                          w_sig1, b_sig1)

    # 1) exact-math path (f32 tables / f32 MXU operands): tight structural check.
    mu32, sig32 = encoder_forward(english, embedding, w_mu1, b_mu1,
                                  w_sig1, b_sig1,
                                  compute_dtype=jnp.float32)
    jax.block_until_ready((mu32, sig32))
    assert mu32.shape == (batch, seq, dim) and sig32.shape == (batch, seq, dim)
    assert jnp.allclose(mu32, mu_ref, atol=1e-4, rtol=1e-4)
    assert jnp.allclose(sig32, sigma_ref, atol=1e-4, rtol=1e-4)
    assert bool(jnp.all(sig32 > 0))

    # 2) fast path (bf16 tables / MXU operands, f32 accumulation + epilogue).
    mu16, sig16 = encoder_forward(english, embedding, w_mu1, b_mu1,
                                  w_sig1, b_sig1,
                                  compute_dtype=jnp.bfloat16)
    jax.block_until_ready((mu16, sig16))
    assert jnp.allclose(mu16, mu_ref, atol=5e-2, rtol=5e-2)
    assert jnp.allclose(sig16, sigma_ref, atol=5e-2, rtol=5e-2)
    assert bool(jnp.all(sig16 > 0))

    # 3) non-divisible batch, multi-step grid (exercises index-pad + grid>1).
    english2 = jax.random.randint(jax.random.PRNGKey(1), (13, seq), 0,
                                  vocab_size_e, dtype=jnp.int32)
    mu_b, sig_b = encoder_forward(english2, embedding, w_mu1, b_mu1,
                                  w_sig1, b_sig1,
                                  compute_dtype=jnp.float32,
                                  rows_per_block=16)   # nb=8 -> Bp=16, grid=2
    jax.block_until_ready((mu_b, sig_b))
    mu_rb, sig_rb = encoder_reference(english2, embedding, w_mu1, b_mu1,
                                      w_sig1, b_sig1)
    assert mu_b.shape == (13, seq, dim) and sig_b.shape == (13, seq, dim)
    assert jnp.allclose(mu_b, mu_rb, atol=1e-4, rtol=1e-4)
    assert jnp.allclose(sig_b, sig_rb, atol=1e-4, rtol=1e-4)

    # 4) bf16-output flag (halves write bytes; semantics gated behind the flag).
    mu_h, sig_h = encoder_forward(english, embedding, w_mu1, b_mu1,
                                  w_sig1, b_sig1,
                                  compute_dtype=jnp.bfloat16,
                                  out_dtype=jnp.bfloat16)
    jax.block_until_ready((mu_h, sig_h))
    assert mu_h.dtype == jnp.bfloat16 and sig_h.dtype == jnp.bfloat16
    assert jnp.allclose(mu_h.astype(jnp.float32), mu_ref, atol=5e-2, rtol=5e-2)
    assert jnp.allclose(sig_h.astype(jnp.float32), sigma_ref, atol=5e-2, rtol=5e-2)

    print("KERNEL_OK")
</pallas_src>

<mosaic_0001>
module attributes {stable_mosaic.version = 11 : i64} {
  func.func @encoder_kernel(%arg0: i32, %arg1: memref<8x8xi32, #tpu.memory_space<vmem>>, %arg2: memref<128x32xf32, #tpu.memory_space<vmem>>, %arg3: memref<128x32xf32, #tpu.memory_space<vmem>>, %arg4: memref<128x32xf32, #tpu.memory_space<vmem>>, %arg5: memref<128x32xf32, #tpu.memory_space<vmem>>, %arg6: memref<1x32xf32, #tpu.memory_space<vmem>>, %arg7: memref<1x32xf32, #tpu.memory_space<vmem>>, %arg8: memref<8x8x32xf32, #tpu.memory_space<vmem>>, %arg9: memref<8x8x32xf32, #tpu.memory_space<vmem>>) attributes {dimension_semantics = [#tpu.dimension_semantics<parallel>], iteration_bounds = array<i64: 1>, scalar_prefetch = 0 : i64, scratch_operands = 0 : i64, tpu.core_type = #tpu.core_type<tc>, window_params = [{transform_indices = @transform_0, window_bounds = array<i64: 8, 8>}, {pipeline_mode = #tpu.pipeline_mode<synchronous>, transform_indices = @transform_1, window_bounds = array<i64: 128, 32>}, {pipeline_mode = #tpu.pipeline_mode<synchronous>, transform_indices = @transform_2, window_bounds = array<i64: 128, 32>}, {pipeline_mode = #tpu.pipeline_mode<synchronous>, transform_indices = @transform_3, window_bounds = array<i64: 128, 32>}, {pipeline_mode = #tpu.pipeline_mode<synchronous>, transform_indices = @transform_4, window_bounds = array<i64: 128, 32>}, {pipeline_mode = #tpu.pipeline_mode<synchronous>, transform_indices = @transform_5, window_bounds = array<i64: 1, 32>}, {pipeline_mode = #tpu.pipeline_mode<synchronous>, transform_indices = @transform_6, window_bounds = array<i64: 1, 32>}, {transform_indices = @transform_7, window_bounds = array<i64: 8, 8, 32>}, {transform_indices = @transform_8, window_bounds = array<i64: 8, 8, 32>}]} {
    %c0 = arith.constant 0 : index
    %c0_0 = arith.constant 0 : index
    %0 = vector.load %arg1[%c0, %c0_0] : memref<8x8xi32, #tpu.memory_space<vmem>>, vector<8x8xi32>
    %1 = tpu.iota {dimensions = array<i32: 2>} : vector<8x8x128xi32>
    %2 = vector.shape_cast %0 : vector<8x8xi32> to vector<8x8x1xi32>
    %3 = vector.broadcast %2 : vector<8x8x1xi32> to vector<8x8x128xi32>
    %4 = arith.cmpi eq, %1, %3 : vector<8x8x128xi32>
    %5 = arith.extui %4 : vector<8x8x128xi1> to vector<8x8x128xi32>
    %6 = arith.sitofp %5 : vector<8x8x128xi32> to vector<8x8x128xf32>
    %7 = vector.shape_cast %6 : vector<8x8x128xf32> to vector<64x128xf32>
    %cst = arith.constant dense<0.000000e+00> : vector<8x128xf32>
    %8 = vector.multi_reduction <add>, %6, %cst [1] : vector<8x8x128xf32> to vector<8x128xf32>
    %c0_1 = arith.constant 0 : index
    %c0_2 = arith.constant 0 : index
    %9 = vector.load %arg2[%c0_1, %c0_2] : memref<128x32xf32, #tpu.memory_space<vmem>>, vector<128x32xf32>
    %cst_3 = arith.constant dense<0.000000e+00> : vector<64x32xf32>
    %10 = tpu.matmul %7, %9, %cst_3 {dimension_numbers = #tpu.dot_dimension_numbers<[1], [0], [0], [1], [0, 0, 1, 1], [], []>} : vector<64x128xf32>, vector<128x32xf32>, vector<64x32xf32> -> vector<64x32xf32>
    %11 = vector.shape_cast %10 : vector<64x32xf32> to vector<8x8x32xf32>
    %c0_4 = arith.constant 0 : index
    %c0_5 = arith.constant 0 : index
    %12 = vector.load %arg4[%c0_4, %c0_5] : memref<128x32xf32, #tpu.memory_space<vmem>>, vector<128x32xf32>
    %cst_6 = arith.constant dense<0.000000e+00> : vector<8x32xf32>
    %13 = tpu.matmul %8, %12, %cst_6 {dimension_numbers = #tpu.dot_dimension_numbers<[1], [0], [0], [1], [0, 0, 1, 1], [], []>} : vector<8x128xf32>, vector<128x32xf32>, vector<8x32xf32> -> vector<8x32xf32>
    %c0_7 = arith.constant 0 : index
    %c0_8 = arith.constant 0 : index
    %14 = vector.load %arg6[%c0_7, %c0_8] : memref<1x32xf32, #tpu.memory_space<vmem>>, vector<1x32xf32>
    %15 = vector.broadcast %14 : vector<1x32xf32> to vector<8x32xf32>
    %16 = arith.addf %13, %15 : vector<8x32xf32>
    %17 = vector.shape_cast %16 : vector<8x32xf32> to vector<8x1x32xf32>
    %18 = vector.broadcast %17 : vector<8x1x32xf32> to vector<8x8x32xf32>
    %19 = arith.addf %11, %18 : vector<8x8x32xf32>
    %c0_9 = arith.constant 0 : index
    %c0_10 = arith.constant 0 : index
    %c0_11 = arith.constant 0 : index
    %20 = vector.load %arg8[%c0_9, %c0_10, %c0_11] : memref<8x8x32xf32, #tpu.memory_space<vmem>>, vector<8x8x32xf32>
    tpu.vector_store %arg8[%c0_9, %c0_10, %c0_11], %19 {strides = array<i32>} : memref<8x8x32xf32, #tpu.memory_space<vmem>>, vector<8x8x32xf32>,
    %c0_12 = arith.constant 0 : index
    %c0_13 = arith.constant 0 : index
    %21 = vector.load %arg3[%c0_12, %c0_13] : memref<128x32xf32, #tpu.memory_space<vmem>>, vector<128x32xf32>
    %cst_14 = arith.constant dense<0.000000e+00> : vector<64x32xf32>
    %22 = tpu.matmul %7, %21, %cst_14 {dimension_numbers = #tpu.dot_dimension_numbers<[1], [0], [0], [1], [0, 0, 1, 1], [], []>} : vector<64x128xf32>, vector<128x32xf32>, vector<64x32xf32> -> vector<64x32xf32>
    %23 = vector.shape_cast %22 : vector<64x32xf32> to vector<8x8x32xf32>
    %c0_15 = arith.constant 0 : index
    %c0_16 = arith.constant 0 : index
    %24 = vector.load %arg5[%c0_15, %c0_16] : memref<128x32xf32, #tpu.memory_space<vmem>>, vector<128x32xf32>
    %cst_17 = arith.constant dense<0.000000e+00> : vector<8x32xf32>
    %25 = tpu.matmul %8, %24, %cst_17 {dimension_numbers = #tpu.dot_dimension_numbers<[1], [0], [0], [1], [0, 0, 1, 1], [], []>} : vector<8x128xf32>, vector<128x32xf32>, vector<8x32xf32> -> vector<8x32xf32>
    %c0_18 = arith.constant 0 : index
    %c0_19 = arith.constant 0 : index
    %26 = vector.load %arg7[%c0_18, %c0_19] : memref<1x32xf32, #tpu.memory_space<vmem>>, vector<1x32xf32>
    %27 = vector.broadcast %26 : vector<1x32xf32> to vector<8x32xf32>
    %28 = arith.addf %25, %27 : vector<8x32xf32>
    %29 = vector.shape_cast %28 : vector<8x32xf32> to vector<8x1x32xf32>
    %30 = vector.broadcast %29 : vector<8x1x32xf32> to vector<8x8x32xf32>
    %31 = arith.addf %23, %30 : vector<8x8x32xf32>
    %cst_20 = arith.constant 0.000000e+00 : f32
    %32 = vector.broadcast %cst_20 : f32 to vector<8x8x32xf32>
    %33 = arith.maximumf %31, %32 : vector<8x8x32xf32>
    %34 = vector.broadcast %cst_20 : f32 to vector<8x8x32xf32>
    %35 = arith.subf %31, %34 : vector<8x8x32xf32>
    %36 = arith.cmpf one, %35, %35 : vector<8x8x32xf32>
    %37 = vector.broadcast %cst_20 : f32 to vector<8x8x32xf32>
    %38 = arith.addf %31, %37 : vector<8x8x32xf32>
    %39 = math.absf %35 : vector<8x8x32xf32>
    %cst_21 = arith.constant 0.000000e+00 : f32
    %40 = vector.broadcast %cst_21 : f32 to vector<8x8x32xf32>
    %41 = arith.subf %40, %39 : vector<8x8x32xf32>
    %42 = math.exp %41 : vector<8x8x32xf32>
    %43 = math.log1p %42 : vector<8x8x32xf32>
    %44 = arith.addf %33, %43 : vector<8x8x32xf32>
    %45 = arith.select %36, %38, %44 : vector<8x8x32xi1>, vector<8x8x32xf32>
    %c0_22 = arith.constant 0 : index
    %c0_23 = arith.constant 0 : index
    %c0_24 = arith.constant 0 : index
    %46 = vector.load %arg9[%c0_22, %c0_23, %c0_24] : memref<8x8x32xf32, #tpu.memory_space<vmem>>, vector<8x8x32xf32>
    tpu.vector_store %arg9[%c0_22, %c0_23, %c0_24], %45 {strides = array<i32>} : memref<8x8x32xf32, #tpu.memory_space<vmem>>, vector<8x8x32xf32>,
    return
  }
  func.func @transform_0(%arg0: i32) -> (i32, i32) {
    %c0_i32 = arith.constant 0 : i32
    %c0_i32_0 = arith.constant 0 : i32
    return %arg0, %c0_i32 : i32, i32
  }
  func.func @transform_1(%arg0: i32) -> (i32, i32) {
    %c0_i32 = arith.constant 0 : i32
    %c0_i32_0 = arith.constant 0 : i32
    %c0_i32_1 = arith.constant 0 : i32
    return %c0_i32, %c0_i32_0 : i32, i32
  }
  func.func @transform_2(%arg0: i32) -> (i32, i32) {
    %c0_i32 = arith.constant 0 : i32
    %c0_i32_0 = arith.constant 0 : i32
    %c0_i32_1 = arith.constant 0 : i32
    return %c0_i32, %c0_i32_0 : i32, i32
  }
  func.func @transform_3(%arg0: i32) -> (i32, i32) {
    %c0_i32 = arith.constant 0 : i32
    %c0_i32_0 = arith.constant 0 : i32
    %c0_i32_1 = arith.constant 0 : i32
    return %c0_i32, %c0_i32_0 : i32, i32
  }
  func.func @transform_4(%arg0: i32) -> (i32, i32) {
    %c0_i32 = arith.constant 0 : i32
    %c0_i32_0 = arith.constant 0 : i32
    %c0_i32_1 = arith.constant 0 : i32
    return %c0_i32, %c0_i32_0 : i32, i32
  }
  func.func @transform_5(%arg0: i32) -> (i32, i32) {
    %c0_i32 = arith.constant 0 : i32
    %c0_i32_0 = arith.constant 0 : i32
    %c0_i32_1 = arith.constant 0 : i32
    return %c0_i32, %c0_i32_0 : i32, i32
  }
  func.func @transform_6(%arg0: i32) -> (i32, i32) {
    %c0_i32 = arith.constant 0 : i32
    %c0_i32_0 = arith.constant 0 : i32
    %c0_i32_1 = arith.constant 0 : i32
    return %c0_i32, %c0_i32_0 : i32, i32
  }
  func.func @transform_7(%arg0: i32) -> (i32, i32, i32) {
    %c0_i32 = arith.constant 0 : i32
    %c0_i32_0 = arith.constant 0 : i32
    %c0_i32_1 = arith.constant 0 : i32
    return %arg0, %c0_i32, %c0_i32_0 : i32, i32, i32
  }
  func.func @transform_8(%arg0: i32) -> (i32, i32, i32) {
    %c0_i32 = arith.constant 0 : i32
    %c0_i32_0 = arith.constant 0 : i32
    %c0_i32_1 = arith.constant 0 : i32
    return %arg0, %c0_i32, %c0_i32_0 : i32, i32, i32
  }
}

</mosaic_0001>

<bundles_post_ra>
// kernel: tpu_custom_call.1
= control target key start
LH: loop header
LB: loop body
LE: loop exit
PB: predicated region body
PF: predicated region fallthrough
CT: control target
= control target key end

     0   :  { %14 = vsyncpa [#allocation3], 0  ;;  %v31_v0 = vlaneseq  ;;  %v1468_v6 = vmov 0.0|0.0   ;;  %s2109_s0 = inlined_call_operand.vmem [shape: s32[8,8], index: 0, kind: input, shape index: {}]   ;;  %s2110_s1 = inlined_call_operand.vmem [shape: f32[128,32], index: 1, kind: input, shape index: {}]   ;;  %s2111_s2 = inlined_call_operand.vmem [shape: f32[128,32], index: 2, kind: input, shape index: {}]   ;;  %s2112_s3 = inlined_call_operand.vmem [shape: f32[128,32], index: 3, kind: input, shape index: {}]   ;;  %s2113_s4 = inlined_call_operand.vmem [shape: f32[128,32], index: 4, kind: input, shape index: {}]   ;;  %s2114_s5 = inlined_call_operand.vmem [shape: f32[1,32], index: 5, kind: input, shape index: {}]   ;;  %s2115_s6 = inlined_call_operand.vmem [shape: f32[1,32], index: 6, kind: input, shape index: {}]   ;;  %s2116_s7 = inlined_call_operand.hbm [shape: f32[8,8,32], index: 7, kind: output, shape index: {0}]   ;;  %s2117_s8 = inlined_call_operand.hbm [shape: f32[8,8,32], index: 8, kind: output, shape index: {1}]  }
   0x1   :  { %v161_v1 = vld [vmem:[%s2110_s1] sm:$0xff]  ;;  %v162_v2 = vld [vmem:[%s2110_s1 + $0x8] sm:$0xff]  ;;  %v163_v4 = vld [vmem:[%s2110_s1 + $0x10] sm:$0xff]  ;;  %1299 = vmatprep.subr.bf16.mxu1 %v1468_v6 }
   0x2   :  { %v1267_v3 = vpack.c.bf16 %v162_v2, %v161_v1  ;;  %v164_v5 = vld [vmem:[%s2110_s1 + $0x18] sm:$0xff]  ;;  %v1536_v7 = vshrl.u32 %v31_v0, 7  ;;  %v30_v9 = vld [vmem:[%s2109_s0] sm:$0xff]  ;;  %v166_v11 = vld [vmem:[%s2110_s1 + $0x28] sm:$0xff] }
   0x3   :  { %v1271_v8 = vpack.c.bf16 %v164_v5, %v163_v4  ;;  %v165_v10 = vld [vmem:[%s2110_s1 + $0x20] sm:$0xff]  ;;  %v283_v20 = vld [vmem:[%s2112_s3 + $0x8] sm:$0xff]  ;;  %v167_v21 = vld [vmem:[%s2110_s1 + $0x30] sm:$0xff] }
   0x4   :  { %1268 = vmatprep.subr.bf16.mxu0 %v1267_v3  ;;  %v1548_v12 = vsub.s32 0, %v1536_v7  ;;  %v49_v13 = vsub.s32 2, %v1536_v7  ;;  %v56_v14 = vsub.s32 3, %v1536_v7  ;;  %v42_v15 = vsub.s32 1, %v1536_v7  ;;  %v282_v19 = vld [vmem:[%s2112_s3] sm:$0xff]  ;;  %v168_v22 = vld [vmem:[%s2110_s1 + $0x38] sm:$0xff] }
   0x5   :  { %1270 = vmatpush3.bf16.msra.mxu0 %v1267_v3  ;;  %v1275_v18 = vpack.c.bf16 %v166_v11, %v165_v10  ;;  %v70_v25 = vsub.s32 5, %v1536_v7  ;;  %v63_v26 = vsub.s32 4, %v1536_v7  ;;  %v284_v27 = vld [vmem:[%s2112_s3 + $0x10] sm:$0xff]  ;;  %v285_v28 = vld [vmem:[%s2112_s3 + $0x18] sm:$0xff]  ;;  %v1300_v29 = vpack.c.bf16 %v283_v20, %v282_v19  ;;  %v169_v31 = vld [vmem:[%s2110_s1 + $0x40] sm:$0xff] }
   0x6   :  { %1272 = vmatprep.subr.bf16.mxu0 %v1271_v8  ;;  %v50_v16 = vrot.slane %v30_v9, %v49_v13  ;;  %v36_v17 = vrot.slane %v30_v9, %v1548_v12  ;;  %v57_v23 = vrot.slane %v30_v9, %v56_v14  ;;  %v43_v24 = vrot.slane %v30_v9, %v42_v15  ;;  %v170_v32 = vld [vmem:[%s2110_s1 + $0x48] sm:$0xff]  ;;  %v286_v38 = vld [vmem:[%s2112_s3 + $0x20] sm:$0xff] }
   0x7   :  { %v1279_v30 = vpack.c.bf16 %v168_v22, %v167_v21  ;;  %1301 = vmatpush3.bf16.msra.mxu1 %v1300_v29  ;;  %v1303_v33 = vpack.c.bf16 %v285_v28, %v284_v27  ;;  %v71_v34 = vrot.slane %v30_v9, %v70_v25  ;;  %v64_v35 = vrot.slane %v30_v9, %v63_v26  ;;  %v287_v39 = vld [vmem:[%s2112_s3 + $0x28] sm:$0xff] }
   0x8   :  { %52 = vbcast.lane.b32.xlu1 %v50_v16, 256  ;;  %38 = vbcast.lane.b32.xlu0 %v36_v17, 256  ;;  %v84_v36 = vsub.s32 7, %v1536_v7  ;;  %v77_v37 = vsub.s32 6, %v1536_v7 }
   0x9   :  { %1274 = vmatpush3.bf16.msra.mxu0 %v1271_v8  ;;  %1302 = vmatprep.subr.bf16.mxu1 %v1468_v6 }
   0xa   :  { %1276 = vmatprep.subr.bf16.mxu0 %v1275_v18 }
   0xc   :  { %59 = vbcast.lane.b32.xlu1 %v57_v23, 256  ;;  %45 = vbcast.lane.b32.xlu0 %v43_v24, 256 }
   0xd   :  { %1278 = vmatpush3.bf16.msra.mxu0 %v1275_v18 }
   0xe   :  { %15 = vsyncpa [#allocation5], 0  ;;  %1280 = vmatprep.subr.bf16.mxu0 %v1279_v30  ;;  %v1283_v40 = vpack.c.bf16 %v170_v32, %v169_v31  ;;  %v171_v41 = vld [vmem:[%s2110_s1 + $0x50] sm:$0xff]  ;;  %v172_v42 = vld [vmem:[%s2110_s1 + $0x58] sm:$0xff]  ;;  %1304 = vmatpush3.bf16.msra.mxu1 %v1303_v33  ;;  %v1306_v43 = vpack.c.bf16 %v287_v39, %v286_v38  ;;  %v85_v44 = vrot.slane %v30_v9, %v84_v36  ;;  %vm1469_vm0 = vmmov 0  }
   0xf   :  { %v78_v45 = vrot.slane %v30_v9, %v77_v37  ;;  %v288_v46 = vld [vmem:[%s2112_s3 + $0x30] sm:$0xff]  ;;  %v289_v47 = vld [vmem:[%s2112_s3 + $0x38] sm:$0xff]  ;;  %1305 = vmatprep.subr.bf16.mxu1 %v1468_v6  ;;  %v1287_v48 = vpack.c.bf16 %v172_v42, %v171_v41  ;;  %v173_v49 = vld [vmem:[%s2110_s1 + $0x60] sm:$0xff]  ;;  %v1470_v55 = vmov 0.0   ;;  %v1653_v11 = vand.u32 127, %v31_v0 }
  0x10   :  { %73 = vbcast.lane.b32.xlu1 %v71_v34, 256  ;;  %66 = vbcast.lane.b32.xlu0 %v64_v35, 256  ;;  %v174_v50 = vld [vmem:[%s2110_s1 + $0x68] sm:$0xff]  ;;  %v1309_v51 = vpack.c.bf16 %v289_v47, %v288_v46  ;;  %v290_v52 = vld [vmem:[%s2112_s3 + $0x40] sm:$0xff]  ;;  %v175_v56 = vld [vmem:[%s2110_s1 + $0x70] sm:$0xff]  ;;  %v1471_v18 = vmov 1.0  }
  0x11   :  { %1282 = vmatpush3.bf16.msra.mxu0 %v1279_v30  ;;  %v291_v53 = vld [vmem:[%s2112_s3 + $0x48] sm:$0xff]  ;;  %v1291_v54 = vpack.c.bf16 %v174_v50, %v173_v49  ;;  %1185 = vmatprep.mubr.msk.f32.mxu1 %vm1469_vm0, %v1470_v55  ;;  %v176_v57 = vld [vmem:[%s2110_s1 + $0x78] sm:$0xff]  ;;  %v292_v59 = vld [vmem:[%s2112_s3 + $0x50] sm:$0xff]  ;;  %vm313_vm7 = vcmask 1041409   ;;  %vm315_vm10 = vcmask 1042434   ;;  %vm317_vm11 = vcmask 1043459  }
  0x12   :  { %1284 = vmatprep.subr.bf16.mxu0 %v1283_v40  ;;  %1307 = vmatpush3.bf16.msra.mxu1 %v1306_v43  ;;  %v1312_v58 = vpack.c.bf16 %v291_v53, %v290_v52  ;;  %v293_v60 = vld [vmem:[%s2112_s3 + $0x58] sm:$0xff]  ;;  %v1295_v61 = vpack.c.bf16 %v176_v57, %v175_v56  ;;  %v505_v62 = vld [vmem:[%s2111_s2] sm:$0xff]  ;;  %v506_v63 = vld [vmem:[%s2111_s2 + $0x8] sm:$0xff]  ;;  %vm319_vm12 = vcmask 1044484   ;;  %vm321_vm13 = vcmask 1045509  }
  0x13   :  { %1308 = vmatprep.subr.bf16.mxu1 %v1468_v6  ;;  %v1315_v1 = vpack.c.bf16 %v293_v60, %v292_v59  ;;  %v294_v2 = vld [vmem:[%s2112_s3 + $0x60] sm:$0xff]  ;;  %v295_v3 = vld [vmem:[%s2112_s3 + $0x68] sm:$0xff]  ;;  %v1323_v4 = vpack.c.bf16 %v506_v63, %v505_v62  ;;  %v296_v8 = vld [vmem:[%s2112_s3 + $0x70] sm:$0xff]  ;;  %vm323_vm14 = vcmask 1046534   ;;  %vm325_vm15 = vcmask 1047559  }
  0x14   :  { %87 = vbcast.lane.b32.xlu1 %v85_v44, 256  ;;  %80 = vbcast.lane.b32.xlu0 %v78_v45, 256  ;;  %v1318_v5 = vpack.c.bf16 %v295_v3, %v294_v2  ;;  %v297_v9 = vld [vmem:[%s2112_s3 + $0x78] sm:$0xff]  ;;  %v507_v15 = vld [vmem:[%s2111_s2 + $0x10] sm:$0xff]  ;;  %v509_v26 = vld [vmem:[%s2111_s2 + $0x20] sm:$0xff] }
  0x15   :  { %1286 = vmatpush3.bf16.msra.mxu0 %v1283_v40  ;;  %v1321_v10 = vpack.c.bf16 %v297_v9, %v296_v8  ;;  %v508_v16 = vld [vmem:[%s2111_s2 + $0x18] sm:$0xff]  ;;  %v510_v27 = vld [vmem:[%s2111_s2 + $0x28] sm:$0xff]  ;;  %v511_v40 = vld [vmem:[%s2111_s2 + $0x30] sm:$0xff] }
  0x16   :  { %1288 = vmatprep.subr.bf16.mxu0 %v1287_v48  ;;  %1310 = vmatpush3.bf16.msra.mxu1 %v1309_v51  ;;  %v1327_v23 = vpack.c.bf16 %v508_v16, %v507_v15  ;;  %v1331_v36 = vpack.c.bf16 %v510_v27, %v509_v26  ;;  %v512_v41 = vld [vmem:[%s2111_s2 + $0x38] sm:$0xff]  ;;  %v513_v42 = vld [vmem:[%s2111_s2 + $0x40] sm:$0xff]  ;;  %v514_v43 = vld [vmem:[%s2111_s2 + $0x48] sm:$0xff] }
  0x17   :  { %1311 = vmatprep.subr.bf16.mxu1 %v1468_v6  ;;  %v1335_v51 = vpack.c.bf16 %v512_v41, %v511_v40  ;;  %v1339_v56 = vpack.c.bf16 %v514_v43, %v513_v42  ;;  %v626_v43 = vld [vmem:[%s2113_s4] sm:$0xff] }
  0x19   :  { %1290 = vmatpush3.bf16.msra.mxu0 %v1287_v48 }
  0x1a   :  { %1292 = vmatprep.subr.bf16.mxu0 %v1291_v54  ;;  %1313 = vmatpush3.bf16.msra.mxu1 %v1312_v58 }
  0x1b   :  { %1314 = vmatprep.subr.bf16.mxu1 %v1468_v6 }
  0x1d   :  { %1294 = vmatpush3.bf16.msra.mxu0 %v1291_v54 }
  0x1e   :  { %1296 = vmatprep.subr.bf16.mxu0 %v1295_v61  ;;  %1316 = vmatpush3.bf16.msra.mxu1 %v1315_v1 }
  0x1f   :  { %1317 = vmatprep.subr.bf16.mxu1 %v1468_v6 }
  0x21   :  { %1298 = vmatpush3.bf16.msra.mxu0 %v1295_v61 }
  0x22   :  { %1324 = vmatprep.subr.bf16.mxu0 %v1323_v4  ;;  %1319 = vmatpush3.bf16.msra.mxu1 %v1318_v5  ;;  %v516_v5 = vld [vmem:[%s2111_s2 + $0x58] sm:$0xff] }
  0x23   :  { %1320 = vmatprep.subr.bf16.mxu1 %v1468_v6 }
  0x26   :  { %1322 = vmatpush3.bf16.msra.mxu1 %v1321_v10 }
  0x27   :  { %1355 = vmatprep.subr.bf16.mxu1 %v1468_v6 }
  0x7a   :  { %v1655_v13 = vpop.permute.xlu1 %52  ;;  %v1657_v14 = vpop.permute.xlu0 %38 }
  0x7b   :  { %vm91_vm1 = vcmp.eq.s32.totalorder %v1653_v11, %v1655_v13  ;;  %vm89_vm2 = vcmp.eq.s32.totalorder %v1653_v11, %v1657_v14 }
  0x7c   :  { %v1003_v0 = vsel %vm91_vm1, 1.0, %v1470_v55  ;;  %v1001_v17 = vsel %vm89_vm2, 1.0, %v1470_v55  ;;  %1141 = vmatprep.mubr.msk.f32.mxu0 %vm89_vm2, %v1471_v18 }
  0x7d   :  { %v125_v19 = vrot.slane %v1003_v0, 4  ;;  %v113_v20 = vrot.slane %v1001_v17, 4 }
  0x7e   :  { %v1681_v21 = vpop.permute.xlu1 %59  ;;  %v1683_v22 = vpop.permute.xlu0 %45 }
  0x7f   :  { %v126_v24 = vadd.f32 %v1003_v0, %v125_v19  ;;  %v114_v25 = vadd.f32 %v1001_v17, %v113_v20  ;;  %vm92_vm3 = vcmp.eq.s32.totalorder %v1653_v11, %v1681_v21  ;;  %vm90_vm4 = vcmp.eq.s32.totalorder %v1653_v11, %v1683_v22  ;;  %v636_v22 = vld [vmem:[%s2113_s4 + $0x50] sm:$0xff] }
  0x80   :  { %v1004_v28 = vsel %vm92_vm3, 1.0, %v1470_v55  ;;  %v1002_v29 = vsel %vm90_vm4, 1.0, %v1470_v55  ;;  %1142 = vmatmul.mubr.msk.f32.vlgmr.msra.gmra.mrb[0].mxu0 %vm90_vm4, %v1471_v18 }
  0x81   :  { %v127_v30 = vrot.slane %v126_v24, 2  ;;  %v115_v31 = vrot.slane %v114_v25, 2  ;;  %v131_v32 = vrot.slane %v1004_v28, 4  ;;  %v119_v33 = vrot.slane %v1002_v29, 4  ;;  %1326 = vmatpush3.bf16.msra.mxu0 %v1323_v4  ;;  %1144 = vmatprep.mubr.msk.f32.mxu0 %vm91_vm1, %v1471_v18  ;;  %v515_v4 = vld [vmem:[%s2111_s2 + $0x50] sm:$0xff] }
  0x82   :  { %v1711_v34 = vpop.permute.xlu1 %73  ;;  %v1713_v35 = vpop.permute.xlu0 %66  ;;  %1328 = vmatprep.subr.bf16.mxu0 %v1327_v23 }
  0x83   :  { %v116_v37 = vadd.f32 %v115_v31, %v114_v25  ;;  %v132_v38 = vadd.f32 %v1004_v28, %v131_v32  ;;  %v120_v39 = vadd.f32 %v1002_v29, %v119_v33  ;;  %vm94_vm5 = vcmp.eq.s32.totalorder %v1653_v11, %v1711_v34  ;;  %v517_v28 = vld [vmem:[%s2111_s2 + $0x60] sm:$0xff]  ;;  %v518_v29 = vld [vmem:[%s2111_s2 + $0x68] sm:$0xff] }
  0x84   :  { %vm93_vm6 = vcmp.eq.s32.totalorder %v1653_v11, %v1713_v35  ;;  %1145 = vmatmul.mubr.msk.f32.gmra.mrb[2].mxu0 %vm92_vm3, %v1471_v18  ;;  %v128_v44 = vadd.f32 %v127_v30, %v126_v24  ;;  %v1006_v47 = vsel %vm94_vm5, 1.0, %v1470_v55  ;;  %v638_v35 = vld [vmem:[%s2113_s4 + $0x60] sm:$0xff] }
  0x85   :  { %v133_v45 = vrot.slane %v132_v38, 2  ;;  %v121_v46 = vrot.slane %v120_v39, 2  ;;  %1330 = vmatpush3.bf16.msra.mxu0 %v1327_v23  ;;  %1147 = vmatprep.mubr.msk.f32.mxu0 %vm93_vm6, %v1471_v18  ;;  %v1005_v48 = vsel %vm93_vm6, 1.0, %v1470_v55  ;;  %v117_v52 = vrot.slane %v116_v37, 1 }
  0x86   :  { %v1747_v49 = vpop.permute.xlu1 %87  ;;  %v1749_v50 = vpop.permute.xlu0 %80  ;;  %1332 = vmatprep.subr.bf16.mxu0 %v1331_v36  ;;  %v143_v57 = vrot.slane %v1006_v47, 4  ;;  %v137_v58 = vrot.slane %v1005_v48, 4  ;;  %v129_v59 = vrot.slane %v128_v44, 1  ;;  %v1343_v23 = vpack.c.bf16 %v516_v5, %v515_v4  ;;  %v635_v4 = vld [vmem:[%s2113_s4 + $0x48] sm:$0xff]  ;;  %v637_v5 = vld [vmem:[%s2113_s4 + $0x58] sm:$0xff] }
  0x87   :  { %v134_v53 = vadd.f32 %v133_v45, %v132_v38  ;;  %v122_v54 = vadd.f32 %v121_v46, %v120_v39  ;;  %vm96_vm8 = vcmp.eq.s32.totalorder %v1653_v11, %v1747_v49  ;;  %vm95_vm9 = vcmp.eq.s32.totalorder %v1653_v11, %v1749_v50  ;;  %v519_v45 = vld [vmem:[%s2111_s2 + $0x70] sm:$0xff]  ;;  %v520_v46 = vld [vmem:[%s2111_s2 + $0x78] sm:$0xff] }
  0x88   :  { %1148 = vmatmul.mubr.msk.f32.gmra.mrb[4].mxu0 %vm94_vm5, %v1471_v18  ;;  %v1008_v61 = vsel %vm96_vm8, 1.0, %v1470_v55  ;;  %v1007_v62 = vsel %vm95_vm9, 1.0, %v1470_v55  ;;  %v144_v63 = vadd.f32 %v1006_v47, %v143_v57  ;;  %v138_v1 = vadd.f32 %v1005_v48, %v137_v58  ;;  %v628_v57 = vld [vmem:[%s2113_s4 + $0x10] sm:$0xff]  ;;  %v629_v58 = vld [vmem:[%s2113_s4 + $0x18] sm:$0xff] }
  0x89   :  { %v123_v60 = vrot.slane %v122_v54, 1  ;;  %1334 = vmatpush3.bf16.msra.mxu0 %v1331_v36  ;;  %1150 = vmatprep.mubr.msk.f32.mxu0 %vm95_vm9, %v1471_v18  ;;  %v155_v2 = vrot.slane %v1008_v61, 4  ;;  %v149_v3 = vrot.slane %v1007_v62, 4  ;;  %v118_v8 = vadd.f32 %v117_v52, %v116_v37  ;;  %v640_v50 = vld [vmem:[%s2113_s4 + $0x70] sm:$0xff] }
  0x8a   :  { %1336 = vmatprep.subr.bf16.mxu0 %v1335_v51  ;;  %v135_v9 = vrot.slane %v134_v53, 1  ;;  %v145_v15 = vrot.slane %v144_v63, 2  ;;  %v139_v16 = vrot.slane %v138_v1, 2  ;;  %v130_v19 = vadd.f32 %v129_v59, %v128_v44  ;;  %v627_v44 = vld [vmem:[%s2113_s4 + $0x8] sm:$0xff] }
  0x8b   :  { %v124_v10 = vadd.f32 %v123_v60, %v122_v54  ;;  %v156_v0 = vadd.f32 %v1008_v61, %v155_v2  ;;  %v150_v17 = vadd.f32 %v1007_v62, %v149_v3  ;;  %v1347_v38 = vpack.c.bf16 %v518_v29, %v517_v28  ;;  %v630_v61 = vld [vmem:[%s2113_s4 + $0x20] sm:$0xff]  ;;  %v631_v62 = vld [vmem:[%s2113_s4 + $0x28] sm:$0xff]  ;;  %v633_v2 = vld [vmem:[%s2113_s4 + $0x38] sm:$0xff] }
  0x8c   :  { %1151 = vmatmul.mubr.msk.f32.gmra.mrb[6].mxu0 %vm96_vm8, %v1471_v18  ;;  %v146_v24 = vadd.f32 %v145_v15, %v144_v63  ;;  %v140_v25 = vadd.f32 %v139_v16, %v138_v1  ;;  %v136_v30 = vadd.f32 %v135_v9, %v134_v53  ;;  %v1356_v53 = vpack.c.bf16 %v627_v44, %v626_v43  ;;  %v632_v1 = vld [vmem:[%s2113_s4 + $0x30] sm:$0xff]  ;;  %v634_v3 = vld [vmem:[%s2113_s4 + $0x40] sm:$0xff]  ;;  %v641_v9 = vld [vmem:[%s2113_s4 + $0x78] sm:$0xff] }
  0x8d   :  { %v314_v20 = vsel %vm313_vm7, %v124_v10, %v118_v8  ;;  %1338 = vmatpush3.bf16.msra.mxu0 %v1335_v51  ;;  %1220 = vmatprep.mubr.msk.f32.mxu0 %vm89_vm2, %v1471_v18  ;;  %v157_v26 = vrot.slane %v156_v0, 2  ;;  %v151_v27 = vrot.slane %v150_v17, 2  ;;  %v1359_v60 = vpack.c.bf16 %v629_v58, %v628_v57  ;;  %v639_v8 = vld [vmem:[%s2113_s4 + $0x68] sm:$0xff]  ;;  %s1473_s4 = smov [#allocation2]  }
  0x8e   :  { %1340 = vmatprep.subr.bf16.mxu0 %v1339_v56  ;;  %v316_v31 = vsel %vm315_vm10, %v130_v19, %v314_v20  ;;  %v147_v14 = vrot.slane %v146_v24, 1  ;;  %v141_v32 = vrot.slane %v140_v25, 1  ;;  %v1362_v63 = vpack.c.bf16 %v631_v62, %v630_v61 }
  0x8f   :  { %v158_v33 = vadd.f32 %v157_v26, %v156_v0  ;;  %v152_v36 = vadd.f32 %v151_v27, %v150_v17  ;;  %v318_v37 = vsel %vm317_vm11, %v136_v30, %v316_v31  ;;  %v1368_v13 = vpack.c.bf16 %v635_v4, %v634_v3 }
  0x90   :  { %v148_v39 = vadd.f32 %v147_v14, %v146_v24  ;;  %v142_v40 = vadd.f32 %v141_v32, %v140_v25  ;;  %v1371_v21 = vpack.c.bf16 %v637_v5, %v636_v22  ;;  %v1374_v34 = vpack.c.bf16 %v639_v8, %v638_v35  ;;  %v1017_v25 = vld [vmem:[%s2114_s5] ss:$0 sm:$0xff]  ;;  %s974_s5 = sshll.u32 %s1473_s4, 4  ;;  %s975_s5 = int_to_ptr.vmem [resolvable:$true] %s974_s5 }
  0x91   :  { %1342 = vmatpush3.bf16.msra.mxu0 %v1339_v56  ;;  %v159_v41 = vrot.slane %v158_v33, 1  ;;  %v153_v42 = vrot.slane %v152_v36, 1  ;;  %v1351_v56 = vpack.c.bf16 %v520_v46, %v519_v45  ;;  %v1377_v10 = vpack.c.bf16 %v641_v9, %v640_v50  ;;  %s1420_s2 = scalar_lea.vmem %s975_s5, 1024  ;;  %p1425_p1 = scmp.lt.s32.totalorder %s975_s5, %s975_s5 }
  0x92   :  { %1344 = vmatprep.subr.bf16.mxu0 %v1343_v23  ;;  %v320_v51 = vsel %vm319_vm12, %v142_v40, %v318_v37  ;;  %v1472_v20 = vmov 1966171168   ;;  %p1421_p0 = scmp.ne.s32.totalorder %s975_s5, %s1420_s2  ;;  %p1426_p2 = scmp.lt.s32.totalorder %s1420_s2, %s1420_s2 }
  0x93   :  { %v154_v47 = vadd.f32 %v153_v42, %v152_v36  ;;  %v160_v48 = vadd.f32 %v159_v41, %v158_v33  ;;  %v322_v52 = vsel %vm321_vm13, %v148_v39, %v320_v51 }
  0x94   :  { %p1427_p3 = por %p1426_p2, %p1425_p1 }
  0x95   :  { %1346 = vmatpush3.bf16.msra.mxu0 %v1343_v23  ;;  %v324_v54 = vsel %vm323_vm14, %v154_v47, %v322_v52  ;;  %v401_v23 = vunpack.c.l.s4 %v1472_v20 }
  0x96   :  { %1348 = vmatprep.subr.bf16.mxu0 %v1347_v38  ;;  %v326_v59 = vsel %vm325_vm15, %v160_v48, %v324_v54  ;;  %p1428_p4 = pnand %p1427_p3, %p1421_p0 }
  0x97   :  { %1186 = vmatmul.mubr.f32.vlgmr.msra.gmra.mrb[0].mxu1 %v326_v59  ;;  %v402_v24 = vunpack.c.0.s8 %v401_v23 }
  0x98   :  { %1357 = vmatpush3.bf16.msra.mxu1 %v1356_v53  ;;  %1264 = vmatprep.mubr.msk.f32.mxu1 %vm1469_vm0, %v1470_v55  ;;  %v1365_v55 = vpack.c.bf16 %v633_v2, %v632_v1  ;;  %vm496_vm0 = vcmask 261120  }
  0x99   :  { %1350 = vmatpush3.bf16.msra.mxu0 %v1347_v38  ;;  %1358 = vmatprep.subr.bf16.mxu1 %v1468_v6  ;;  %v1889_v26 = vsub.s32 %v402_v24, %v1536_v7 }
  0x9a   :  { %1352 = vmatprep.subr.bf16.mxu0 %v1351_v56 }
  0x9c   :  { %1360 = vmatpush3.bf16.msra.mxu1 %v1359_v60 }
  0x9d   :  { %1354 = vmatpush3.bf16.msra.mxu0 %v1351_v56  ;;  %1361 = vmatprep.subr.bf16.mxu1 %v1468_v6 }
  0xa0   :  { %1221 = vmatmul.mubr.msk.f32.vlgmr.msra.gmra.mrb[8].mxu0 %vm90_vm4, %v1471_v18  ;;  %1363 = vmatpush3.bf16.msra.mxu1 %v1362_v63 }
  0xa1   :  { %1223 = vmatprep.mubr.msk.f32.mxu0 %vm91_vm1, %v1471_v18  ;;  %1364 = vmatprep.subr.bf16.mxu1 %v1468_v6 }
  0xa4   :  { %1224 = vmatmul.mubr.msk.f32.gmra.mrb[10].mxu0 %vm92_vm3, %v1471_v18  ;;  %1366 = vmatpush3.bf16.msra.mxu1 %v1365_v55 }
  0xa5   :  { %1226 = vmatprep.mubr.msk.f32.mxu0 %vm93_vm6, %v1471_v18  ;;  %1367 = vmatprep.subr.bf16.mxu1 %v1468_v6 }
  0xa8   :  { %1227 = vmatmul.mubr.msk.f32.gmra.mrb[12].mxu0 %vm94_vm5, %v1471_v18  ;;  %1369 = vmatpush3.bf16.msra.mxu1 %v1368_v13 }
  0xa9   :  { %1229 = vmatprep.mubr.msk.f32.mxu0 %vm95_vm9, %v1471_v18  ;;  %1370 = vmatprep.subr.bf16.mxu1 %v1468_v6 }
  0xac   :  { %1230 = vmatmul.mubr.msk.f32.gmra.mrb[14].mxu0 %vm96_vm8, %v1471_v18  ;;  %1372 = vmatpush3.bf16.msra.mxu1 %v1371_v21 }
  0xad   :  { %1373 = vmatprep.subr.bf16.mxu1 %v1468_v6 }
  0xb0   :  { %1375 = vmatpush3.bf16.msra.mxu1 %v1374_v34 }
  0xb1   :  { %1376 = vmatprep.subr.bf16.mxu1 %v1468_v6 }
  0xb4   :  { %1378 = vmatpush3.bf16.msra.mxu1 %v1377_v10 }
  0xb7   :  { %1265 = vmatmul.mubr.f32.vlgmr.msra.gmra.mrb[2].mxu1 %v326_v59 }
 0x153   :  { %v1143_v11 = vpop.f32.mrb[0].mxu0 }
 0x154   :  { %v243_v18 = vpop.f32.mrb[1].mxu0 }
 0x157   :  { %v1146_v49 = vpop.f32.mrb[2].mxu0 }
 0x158   :  { %v253_v15 = vpop.f32.mrb[3].mxu0 }
 0x15b   :  { %v1149_v16 = vpop.f32.mrb[4].mxu0 }
 0x15c   :  { %v263_v0 = vpop.f32.mrb[5].mxu0 }
 0x15f   :  { %v1152_v17 = vpop.f32.mrb[6].mxu0 }
 0x160   :  { %v273_v19 = vpop.f32.mrb[7].mxu0 }
 0x16a   :  { %v394_v6 = vpop.f32.mrb[0].mxu1 }
 0x16b   :  { %v395_v27 = vadd.f32 %v1017_v25, %v394_v6  ;;  %v1187_v28 = vpop.f32.mrb[1].mxu1 }
 0x16d   :  { %v399_v29 = vcombine.high %v395_v27, %v395_v27  ;;  %v406_v30 = vrot.slane %v395_v27, %v1889_v26 }
 0x16f   :  { %v413_v31 = vrot.slane %v399_v29, %v1889_v26  ;;  %v414_v14 = vcombine.high %v406_v30, %v406_v30  ;;  %v422_v32 = vrot.slane %v406_v30, %v1889_v26 }
 0x171   :  { %v415_v33 = vcombine.high %v413_v31, %v413_v31  ;;  %v429_v36 = vrot.slane %v413_v31, %v1889_v26  ;;  %v436_v37 = vrot.slane %v414_v14, %v1889_v26  ;;  %v444_v38 = vcombine.high %v422_v32, %v422_v32 }
 0x172   :  { %v451_v7 = vrot.slane %v422_v32, %v1548_v12 }
 0x173   :  { %v1897_v39 = vpop.f32.mrb[8].mxu0  ;;  %v443_v40 = vrot.slane %v415_v33, %v1889_v26  ;;  %v445_v41 = vcombine.high %v429_v36, %v429_v36  ;;  %v446_v42 = vcombine.high %v436_v37, %v436_v37  ;;  %v455_v43 = vrot.slane %v436_v37, %v1548_v12 }
 0x174   :  { %v1901_v44 = vpop.f32.mrb[9].mxu0  ;;  %v459_v45 = vrot.slane %v444_v38, %v1548_v12  ;;  %v467_v46 = vrot.slane %v429_v36, %v1548_v12  ;;  %v488_v47 = vadd.f32 %v451_v7, %v243_v18 }
 0x175   :  { %v447_v48 = vcombine.high %v443_v40, %v443_v40  ;;  %v463_v51 = vrot.slane %v446_v42, %v1548_v12  ;;  %v471_v52 = vrot.slane %v443_v40, %v1548_v12  ;;  %v475_v53 = vrot.slane %v445_v41, %v1548_v12 }
 0x176   :  { %v489_v54 = vadd.f32 %v1143_v11, %v455_v43  ;;  %v490_v56 = vadd.f32 %v459_v45, %v253_v15  ;;  %v492_v57 = vadd.f32 %v467_v46, %v263_v0  ;;  %497 = vst.msk [vmem:[#allocation2] sm:$0xff] %vm496_vm0, %v488_v47 }
 0x177   :  { %v1909_v58 = vpop.f32.mrb[10].mxu0  ;;  %v479_v59 = vrot.slane %v447_v48, %v1548_v12  ;;  %v491_v60 = vadd.f32 %v1146_v49, %v463_v51  ;;  %v493_v61 = vadd.f32 %v1149_v16, %v471_v52  ;;  %v494_v62 = vadd.f32 %v475_v53, %v273_v19 }
 0x178   :  { %v597_v63 = vpop.f32.mrb[11].mxu0  ;;  %498 = vst.msk [vmem:[#allocation2 + $0x8] sm:$0xff] %vm496_vm0, %v489_v54  ;;  %499 = vst.msk [vmem:[#allocation2 + $0x10] sm:$0xff] %vm496_vm0, %v490_v56 }
 0x179   :  { %501 = vst.msk [vmem:[#allocation2 + $0x20] sm:$0xff] %vm496_vm0, %v492_v57  ;;  %v495_v1 = vadd.f32 %v1152_v17, %v479_v59  ;;  %500 = vst.msk [vmem:[#allocation2 + $0x18] sm:$0xff] %vm496_vm0, %v491_v60 }
 0x17a   :  { %502 = vst.msk [vmem:[#allocation2 + $0x28] sm:$0xff] %vm496_vm0, %v493_v61  ;;  %503 = vst.msk [vmem:[#allocation2 + $0x30] sm:$0xff] %vm496_vm0, %v494_v62 }
 0x17b   :  { %v1228_v2 = vpop.f32.mrb[12].mxu0  ;;  %504 = vst.msk [vmem:[#allocation2 + $0x38] sm:$0xff] %vm496_vm0, %v495_v1 }
 0x17c   :  { %v607_v55 = vpop.f32.mrb[13].mxu0 }
 0x17d   :  { %1431 = shalt.err (!%p1428_p4)
}
 0x17e   :  { %s1432_s17 = scalar_lea.hbm %s2116_s7, 1024 }
 0x17f   :  { %p1433_p5 = scmp.ne.s32.totalorder %s2116_s7, %s1432_s17  ;;  %p1436_p6 = scmp.lt.u32.totalorder %s1432_s17, %s2116_s7 }
 0x181   :  { %p1438_p7 = pnand %p1436_p6, %p1433_p5 }
 0x183   :  { %1441 = shalt.err (!%p1438_p7)
}
 0x184   :  { %s1474_s20 = smov 128   ;;  %s1475_s21 = smov 8   ;;  %v1231_v3 = vpop.f32.mrb[14].mxu0  ;;  %v1026_v13 = vld [vmem:[%s2115_s6] ss:$0 sm:$0xff] }
 0x185   :  { %980 = dma.vmem_to_hbm [thread:$0]  %s975_s5, 1024, %s2116_s7, [#allocation3], %s1474_s20, %s1474_s20, %s1475_s21   ;;  %v617_v4 = vpop.f32.mrb[15].mxu0 }
 0x186   :  { %s1476_s6 = smov [#allocation4]  }
 0x187   :  { %s986_s7 = sshll.u32 %s1476_s6, 4  ;;  %s987_s7 = int_to_ptr.vmem [resolvable:$true] %s986_s7 }
 0x188   :  { %s1442_s26 = scalar_lea.vmem %s987_s7, 1024  ;;  %p1447_p9 = scmp.lt.s32.totalorder %s987_s7, %s987_s7 }
 0x189   :  { %p1443_p8 = scmp.ne.s32.totalorder %s987_s7, %s1442_s26  ;;  %p1448_p10 = scmp.lt.s32.totalorder %s1442_s26, %s1442_s26 }
 0x18a   :  { %v715_v22 = vpop.f32.mrb[2].mxu1 }
 0x18b   :  { %v716_v5 = vadd.f32 %v1026_v13, %v715_v22  ;;  %v1266_v21 = vpop.f32.mrb[3].mxu1  ;;  %p1449_p11 = por %p1448_p10, %p1447_p9 }
 0x18d   :  { %v720_v35 = vcombine.high %v716_v5, %v716_v5  ;;  %v727_v8 = vrot.slane %v716_v5, %v1889_v26  ;;  %p1450_p12 = pnand %p1449_p11, %p1443_p8 }
 0x18f   :  { %v734_v34 = vrot.slane %v720_v35, %v1889_v26  ;;  %v735_v50 = vcombine.high %v727_v8, %v727_v8  ;;  %v743_v9 = vrot.slane %v727_v8, %v1889_v26 }
 0x191   :  { %v736_v10 = vcombine.high %v734_v34, %v734_v34  ;;  %v750_v11 = vrot.slane %v734_v34, %v1889_v26  ;;  %v757_v18 = vrot.slane %v735_v50, %v1889_v26  ;;  %v765_v49 = vcombine.high %v743_v9, %v743_v9 }
 0x192   :  { %v772_v15 = vrot.slane %v743_v9, %v1548_v12 }
 0x193   :  { %v764_v16 = vrot.slane %v736_v10, %v1889_v26  ;;  %v766_v0 = vcombine.high %v750_v11, %v750_v11  ;;  %v767_v17 = vcombine.high %v757_v18, %v757_v18  ;;  %v776_v19 = vrot.slane %v757_v18, %v1548_v12 }
 0x194   :  { %v780_v20 = vrot.slane %v765_v49, %v1548_v12  ;;  %v788_v23 = vrot.slane %v750_v11, %v1548_v12  ;;  %v1948_v24 = vadd.f32 %v772_v15, %v1901_v44 }
 0x195   :  { %v768_v25 = vcombine.high %v764_v16, %v764_v16  ;;  %v784_v6 = vrot.slane %v767_v17, %v1548_v12  ;;  %v792_v27 = vrot.slane %v764_v16, %v1548_v12  ;;  %v796_v28 = vrot.slane %v766_v0, %v1548_v12 }
 0x196   :  { %v1954_v26 = vadd.f32 %v1897_v39, %v776_v19  ;;  %v1956_v29 = vadd.f32 %v780_v20, %v597_v63  ;;  %v1958_v30 = vadd.f32 %v788_v23, %v607_v55  ;;  %v841_v37 = vand.u32 2147483647, %v1948_v24 }
 0x197   :  { %v800_v31 = vrot.slane %v768_v25, %v1548_v12  ;;  %v1962_v14 = vadd.f32 %v1909_v58, %v784_v6  ;;  %v1964_v32 = vadd.f32 %v1228_v2, %v792_v27  ;;  %v1966_v33 = vadd.f32 %v796_v28, %v617_v4 }
 0x198   :  { %v842_v38 = vand.u32 2147483647, %v1954_v26  ;;  %v843_v7 = vand.u32 2147483647, %v1956_v29  ;;  %v845_v40 = vand.u32 2147483647, %v1958_v30  ;;  %vm825_vm1 = vcmp.ne.f32.partialorder %v1948_v24, %v1948_v24 }
 0x199   :  { %v1968_v36 = vadd.f32 %v1231_v3, %v800_v31  ;;  %v844_v39 = vand.u32 2147483647, %v1962_v14  ;;  %v846_v12 = vand.u32 2147483647, %v1964_v32  ;;  %v847_v41 = vand.u32 2147483647, %v1966_v33 }
 0x19a   :  { %v849_v42 = vsub.f32 0.0, %v841_v37  ;;  %v850_v43 = vsub.f32 0.0, %v842_v38  ;;  %v851_v45 = vsub.f32 0.0, %v843_v7  ;;  %v853_v47 = vsub.f32 0.0, %v845_v40 }
 0x19b   :  { %v848_v44 = vand.u32 2147483647, %v1968_v36  ;;  %v852_v46 = vsub.f32 0.0, %v844_v39  ;;  %v854_v48 = vsub.f32 0.0, %v846_v12  ;;  %v855_v53 = vsub.f32 0.0, %v847_v41 }
 0x19c   :  { %v857_v51 = vmul.f32 1.442695, %v849_v42  ;;  %v859_v52 = vmul.f32 1.442695, %v850_v43  ;;  %v861_v54 = vmul.f32 1.442695, %v851_v45  ;;  %vm826_vm2 = vcmp.ne.f32.partialorder %v1954_v26, %v1954_v26 }
 0x19d   :  { %v863_v56 = vmul.f32 1.442695, %v852_v46  ;;  %v865_v57 = vmul.f32 1.442695, %v853_v47  ;;  %v856_v58 = vsub.f32 0.0, %v848_v44  ;;  %v817_v21 = vmax.f32 %v1948_v24, 0.0 }
 0x19e   :  { %1388 = vpow2.f32 %v857_v51  ;;  %v867_v59 = vmul.f32 1.442695, %v854_v48  ;;  %v869_v60 = vmul.f32 1.442695, %v855_v53  ;;  %v818_v34 = vmax.f32 %v1954_v26, 0.0 }
 0x19f   :  { %1390 = vpow2.f32 %v859_v52  ;;  %v871_v61 = vmul.f32 1.442695, %v856_v58  ;;  %v819_v50 = vmax.f32 %v1956_v29, 0.0  ;;  %v820_v9 = vmax.f32 %v1962_v14, 0.0 }
 0x1a0   :  { %1392 = vpow2.f32 %v861_v54  ;;  %v821_v10 = vmax.f32 %v1958_v30, 0.0  ;;  %v822_v27 = vmax.f32 %v1964_v32, 0.0  ;;  %v823_v28 = vmax.f32 %v1966_v33, 0.0 }
 0x1a1   :  { %1394 = vpow2.f32 %v863_v56  ;;  %vm827_vm4 = vcmp.ne.f32.partialorder %v1956_v29, %v1956_v29  ;;  %vm828_vm7 = vcmp.ne.f32.partialorder %v1962_v14, %v1962_v14  ;;  %vm829_vm11 = vcmp.ne.f32.partialorder %v1958_v30, %v1958_v30 }
 0x1a2   :  { %1396 = vpow2.f32 %v865_v57  ;;  %vm830_vm13 = vcmp.ne.f32.partialorder %v1964_v32, %v1964_v32  ;;  %vm831_vm15 = vcmp.ne.f32.partialorder %v1966_v33, %v1966_v33 }
 0x1a3   :  { %1398 = vpow2.f32 %v867_v59 }
 0x1a4   :  { %1400 = vpow2.f32 %v869_v60 }
 0x1a5   :  { %1402 = vpow2.f32 %v871_v61 }
 0x1a8   :  { %v1389_v62 = vpop.eup %1388 }
 0x1a9   :  { %v1391_v63 = vpop.eup %1390  ;;  %v873_v1 = vadd.f32 1.0, %v1389_v62  ;;  %v876_v22 = vmul.f32 -0.5, %v1389_v62  ;;  %v879_v18 = vand.u32 2147483647, %v1389_v62 }
 0x1aa   :  { %v1393_v2 = vpop.eup %1392  ;;  %v882_v55 = vadd.f32 1.0, %v1391_v63  ;;  %v885_v5 = vmul.f32 -0.5, %v1391_v63  ;;  %v888_v17 = vand.u32 2147483647, %v1391_v63 }
 0x1ab   :  { %v1395_v3 = vpop.eup %1394  ;;  %1404 = vlog2.f32 %v873_v1  ;;  %v891_v4 = vadd.f32 1.0, %v1393_v2  ;;  %v894_v49 = vmul.f32 -0.5, %v1393_v2  ;;  %v877_v16 = vadd.f32 1.0, %v876_v22 }
 0x1ac   :  { %v1978_v13 = vpop.eup %1396  ;;  %1406 = vlog2.f32 %v882_v55  ;;  %v900_v35 = vadd.f32 1.0, %v1395_v3  ;;  %v886_v0 = vadd.f32 1.0, %v885_v5  ;;  %v903_v19 = vmul.f32 -0.5, %v1395_v3 }
 0x1ad   :  { %1408 = vlog2.f32 %v891_v4  ;;  %v1981_v8 = vpop.eup %1398  ;;  %v909_v15 = vadd.f32 1.0, %v1978_v13  ;;  %v897_v23 = vand.u32 2147483647, %v1393_v2  ;;  %v912_v25 = vmul.f32 -0.5, %v1978_v13 }
 0x1ae   :  { %v1987_v11 = vpop.eup %1400  ;;  %1410 = vlog2.f32 %v900_v35  ;;  %v918_v6 = vadd.f32 1.0, %v1981_v8  ;;  %v906_v31 = vand.u32 2147483647, %v1395_v3  ;;  %vm2001_vm3 = vcmp.lt.f32.partialorder %v879_v18, 0.0004427343 }
 0x1af   :  { %v1990_v20 = vpop.eup %1402  ;;  %1412 = vlog2.f32 %v909_v15  ;;  %v927_v37 = vadd.f32 1.0, %v1987_v11  ;;  %v895_v7 = vadd.f32 1.0, %v894_v49  ;;  %vm2007_vm5 = vcmp.lt.f32.partialorder %v888_v17, 0.0004427343 }
 0x1b0   :  { %1414 = vlog2.f32 %v918_v6  ;;  %v904_v40 = vadd.f32 1.0, %v903_v19  ;;  %v936_v12 = vadd.f32 1.0, %v1990_v20  ;;  %v878_v42 = vmul.f32 %v1389_v62, %v877_v16 }
 0x1b1   :  { %1416 = vlog2.f32 %v927_v37  ;;  %v887_v43 = vmul.f32 %v1391_v63, %v886_v0  ;;  %vm2012_vm6 = vcmp.lt.f32.partialorder %v897_v23, 0.0004427343  ;;  %v913_v45 = vadd.f32 1.0, %v912_v25 }
 0x1b2   :  { %vm2018_vm8 = vcmp.lt.f32.partialorder %v906_v31, 0.0004427343  ;;  %v921_v51 = vmul.f32 -0.5, %v1981_v8  ;;  %1418 = vlog2.f32 %v936_v12  ;;  %v896_v54 = vmul.f32 %v1393_v2, %v895_v7 }
 0x1b3   :  { %v915_v56 = vand.u32 2147483647, %v1978_v13  ;;  %v930_v57 = vmul.f32 -0.5, %v1987_v11  ;;  %v905_v60 = vmul.f32 %v1395_v3, %v904_v40  ;;  %v939_v61 = vmul.f32 -0.5, %v1990_v20 }
 0x1b4   :  { %v914_v1 = vmul.f32 %v1978_v13, %v913_v45  ;;  %v924_v55 = vand.u32 2147483647, %v1981_v8  ;;  %v922_v5 = vadd.f32 1.0, %v921_v51  ;;  %v933_v3 = vand.u32 2147483647, %v1987_v11 }
 0x1b5   :  { %v1405_v41 = vpop.eup %1404  ;;  %v931_v49 = vadd.f32 1.0, %v930_v57  ;;  %v940_v0 = vadd.f32 1.0, %v939_v61  ;;  %vm916_vm9 = vcmp.lt.f32.partialorder %v915_v56, 0.0004427343  ;;  %v942_v31 = vand.u32 2147483647, %v1990_v20 }
 0x1b6   :  { %v1407_v46 = vpop.eup %1406  ;;  %v875_v47 = vmul.f32 0.6931472, %v1405_v41  ;;  %vm2048_vm10 = vcmp.lt.f32.partialorder %v924_v55, 0.0004427343  ;;  %v923_v6 = vmul.f32 %v1981_v8, %v922_v5  ;;  %vm934_vm12 = vcmp.lt.f32.partialorder %v933_v3, 0.0004427343 }
 0x1b7   :  { %v1409_v52 = vpop.eup %1408  ;;  %v884_v53 = vmul.f32 0.6931472, %v1407_v46  ;;  %v932_v38 = vmul.f32 %v1987_v11, %v931_v49  ;;  %v941_v39 = vmul.f32 %v1990_v20, %v940_v0  ;;  %vm943_vm14 = vcmp.lt.f32.partialorder %v942_v31, 0.0004427343 }
 0x1b8   :  { %v881_v58 = vsel %vm2001_vm3, %v878_v42, %v875_v47  ;;  %v893_v59 = vmul.f32 0.6931472, %v1409_v52  ;;  %v1411_v62 = vpop.eup %1410 }
 0x1b9   :  { %v890_v63 = vsel %vm2007_vm5, %v887_v43, %v884_v53  ;;  %v945_v2 = vadd.f32 %v881_v58, %v817_v21  ;;  %v902_v22 = vmul.f32 0.6931472, %v1411_v62  ;;  %v1413_v18 = vpop.eup %1412 }
 0x1ba   :  { %v899_v4 = vsel %vm2012_vm6, %v896_v54, %v893_v59  ;;  %v946_v35 = vadd.f32 %v890_v63, %v818_v34  ;;  %v911_v16 = vmul.f32 0.6931472, %v1413_v18  ;;  %v1415_v17 = vpop.eup %1414 }
 0x1bb   :  { %v947_v15 = vadd.f32 %v899_v4, %v819_v50  ;;  %v953_v13 = vsel %vm825_vm1, %v1948_v24, %v945_v2  ;;  %v908_v21 = vsel %vm2018_vm8, %v905_v60, %v902_v22  ;;  %v1417_v23 = vpop.eup %1416  ;;  %v920_v25 = vmul.f32 0.6931472, %v1415_v17 }
 0x1bc   :  { %v954_v34 = vsel %vm826_vm2, %v1954_v26, %v946_v35  ;;  %961 = vst.msk [vmem:[#allocation4] sm:$0xff] %vm496_vm0, %v953_v13  ;;  %v948_v24 = vadd.f32 %v908_v21, %v820_v9  ;;  %v917_v26 = vsel %vm916_vm9, %v914_v1, %v911_v16  ;;  %v929_v37 = vmul.f32 0.6931472, %v1417_v23  ;;  %v1419_v7 = vpop.eup %1418 }
 0x1bd   :  { %v955_v19 = vsel %vm827_vm4, %v1956_v29, %v947_v15  ;;  %962 = vst.msk [vmem:[#allocation4 + $0x8] sm:$0xff] %vm496_vm0, %v954_v34  ;;  %v949_v9 = vadd.f32 %v917_v26, %v821_v10  ;;  %v926_v8 = vsel %vm2048_vm10, %v923_v6, %v920_v25  ;;  %v938_v40 = vmul.f32 0.6931472, %v1419_v7 }
 0x1be   :  { %963 = vst.msk [vmem:[#allocation4 + $0x10] sm:$0xff] %vm496_vm0, %v955_v19  ;;  %v956_v29 = vsel %vm828_vm7, %v1962_v14, %v948_v24  ;;  %v935_v11 = vsel %vm934_vm12, %v932_v38, %v929_v37  ;;  %v950_v10 = vadd.f32 %v926_v8, %v822_v27  ;;  %v824_v14 = vmax.f32 %v1968_v36, 0.0 }
 0x1bf   :  { %964 = vst.msk [vmem:[#allocation4 + $0x18] sm:$0xff] %vm496_vm0, %v956_v29  ;;  %v957_v12 = vsel %vm829_vm11, %v1958_v30, %v949_v9  ;;  %v951_v41 = vadd.f32 %v935_v11, %v823_v28  ;;  %v944_v20 = vsel %vm943_vm14, %v941_v39, %v938_v40  ;;  %vm832_vm1 = vcmp.ne.f32.partialorder %v1968_v36, %v1968_v36 }
 0x1c0   :  { %965 = vst.msk [vmem:[#allocation4 + $0x20] sm:$0xff] %vm496_vm0, %v957_v12  ;;  %v958_v27 = vsel %vm830_vm13, %v1964_v32, %v950_v10  ;;  %v952_v30 = vadd.f32 %v944_v20, %v824_v14 }
 0x1c1   :  { %v959_v42 = vsel %vm831_vm15, %v1966_v33, %v951_v41  ;;  %966 = vst.msk [vmem:[#allocation4 + $0x28] sm:$0xff] %vm496_vm0, %v958_v27 }
 0x1c2   :  { %967 = vst.msk [vmem:[#allocation4 + $0x30] sm:$0xff] %vm496_vm0, %v959_v42  ;;  %v960_v28 = vsel %vm832_vm1, %v1968_v36, %v952_v30 }
 0x1c3   :  { %968 = vst.msk [vmem:[#allocation4 + $0x38] sm:$0xff] %vm496_vm0, %v960_v28 }
 0x1c4   :  { %1453 = shalt.err (!%p1450_p12)
}
 0x1c5   :  { %s1454_s28 = scalar_lea.hbm %s2117_s8, 1024 }
 0x1c6   :  { %p1455_p13 = scmp.ne.s32.totalorder %s2117_s8, %s1454_s28  ;;  %p1458_p0 = scmp.lt.u32.totalorder %s1454_s28, %s2117_s8 }
 0x1c8   :  { %p1460_p1 = pnand %p1458_p0, %p1455_p13 }
 0x1ca   :  { %1463 = shalt.err (!%p1460_p1)
}
 0x1cb   :  { %992 = dma.vmem_to_hbm [thread:$0]  %s987_s7, 1024, %s2117_s8, [#allocation5], %s1474_s20, %s1474_s20, %s1475_s21  }
 0x1cc   :  { %1464 = dma.done.wait [#allocation3], 1024  }
 0x1cd   :  { %1465 = vsyncadd [#allocation3], 4294966272 }
 0x1ce   :  { %1466 = dma.done.wait [#allocation5], 1024  }
 0x1cf   :  { %1467 = vsyncadd [#allocation5], 4294966272 }
 0x1d0   :  { %999 = vsyncpa [#allocation3], 1 }
 0x1d1   :  { %1000 = vsyncpa [#allocation5], 1 }

</bundles_post_ra>
